<compile_context>
chip_gen: v6e
topology: v6e:2x2x1
jax: 0.10.0
libtpu: 0.0.40
codegen_flags: <defaults>
</compile_context>

<pallas_src>
import functools

import numpy as np

import jax
import jax.numpy as jnp
from jax.experimental import pallas as pl
from jax.experimental.pallas import tpu as pltpu


# ----------------------------------------------------------------------------
# Pallas kernel: two lane-dense MXU matmuls, whole problem in one VMEM step.
# ----------------------------------------------------------------------------
def _cavgpool2d_kernel(x_ref, a_ref, k_ref, o_ref):
    # x_ref: (H, W*P)   a_ref: (OH, H)   k_ref: (W*P, OW*P)   o_ref: (OH, OW*P)
    y = jnp.dot(a_ref[...], x_ref[...],
                preferred_element_type=jnp.float32)            # pool along H
    o_ref[...] = jnp.dot(y, k_ref[...],
                         preferred_element_type=jnp.float32)   # pool along W


# ----------------------------------------------------------------------------
# Host-side (static) helpers: output size, divisor counts, pooling matrices.
# These mirror PyTorch's avg_pool2d semantics exactly.
# ----------------------------------------------------------------------------
def _pair(v):
    if isinstance(v, (tuple, list)):
        return int(v[0]), int(v[1])
    return int(v), int(v)


def _pool_out_size(n, k, s, p, ceil_mode):
    if ceil_mode:
        o = -(-(n + 2 * p - k) // s) + 1
        if (o - 1) * s >= n + p:   # last window must start inside input+padding
            o -= 1
    else:
        o = (n + 2 * p - k) // s + 1
    return int(o)


def _axis_counts(n, k, s, p, o, count_include_pad):
    """Per-output-index divisor factor along one spatial axis (PyTorch rules)."""
    cnt = np.zeros((o,), np.float64)
    for i in range(o):
        start = i * s - p
        if count_include_pad:
            lo = start
            hi = min(start + k, n + p)
        else:
            lo = max(start, 0)
            hi = min(start + k, n)
        cnt[i] = max(hi - lo, 1)
    return cnt


def _pool_matrix(n, k, s, p, o, scale):
    """(o, n) matrix: M[i, j] = scale[i] iff valid index j lies in window i.

    Padding is folded in by clipping each window to [0, n): padded positions
    are zeros and never contribute to the numerator.
    """
    M = np.zeros((o, n), np.float32)
    for i in range(o):
        a = max(i * s - p, 0)
        b = min(i * s - p + k, n)
        if b > a:
            M[i, a:b] = scale[i]
    return M


# ----------------------------------------------------------------------------
# Cached builder: constants + pallas_call + jitted layout plumbing per config.
# ----------------------------------------------------------------------------
@functools.lru_cache(maxsize=None)
def _build_cavgpool2d(N, C, H, W, kh, kw, sh, sw, ph, pw,
                      ceil_mode, count_include_pad, divisor_override):
    OH = _pool_out_size(H, kh, sh, ph, ceil_mode)
    OW = _pool_out_size(W, kw, sw, pw, ceil_mode)
    P = 2 * N * C                       # real + imag planes

    # --- static pooling matrices (divisors folded in) -----------------------
    if divisor_override is not None:
        scale_h = np.full((OH,), 1.0 / float(divisor_override), np.float64)
        scale_w = np.ones((OW,), np.float64)
    else:
        scale_h = 1.0 / _axis_counts(H, kh, sh, ph, OH, count_include_pad)
        scale_w = 1.0 / _axis_counts(W, kw, sw, pw, OW, count_include_pad)

    A = _pool_matrix(H, kh, sh, ph, OH, scale_h)            # (OH, H)
    B = _pool_matrix(W, kw, sw, pw, OW, scale_w)            # (OW, W)
    # Pool along W while keeping the plane axis (lane index = w*P + p) intact.
    K = np.kron(B.T, np.eye(P, dtype=np.float32)).astype(np.float32)  # (W*P, OW*P)

    call = pl.pallas_call(
        _cavgpool2d_kernel,
        out_shape=jax.ShapeDtypeStruct((OH, OW * P), jnp.float32),
        in_specs=[pl.BlockSpec(memory_space=pltpu.MemorySpace.VMEM)] * 3,
        out_specs=pl.BlockSpec(memory_space=pltpu.MemorySpace.VMEM),
    )

    A_j = jnp.asarray(A)
    K_j = jnp.asarray(K)

    @jax.jit
    def run(x):
        # split complex -> real/imag planes, fold planes into lanes (w*P + p)
        xr = jnp.real(x).astype(jnp.float32)
        xi = jnp.imag(x).astype(jnp.float32)
        planes = jnp.stack([xr, xi], axis=0).reshape(P, H, W)
        x_in = jnp.transpose(planes, (1, 2, 0)).reshape(H, W * P)   # (H, W*P)

        out = call(x_in, A_j, K_j)                                  # (OH, OW*P)

        out = out.reshape(OH, OW, P).transpose(2, 0, 1).reshape(2, N, C, OH, OW)
        return (out[0] + 1j * out[1]).astype(jnp.complex64)

    return run


def cavg_pool2d(x, kernel_size, stride=None, padding=0, ceil_mode=False,
                count_include_pad=True, divisor_override=None):
    """x: complex64 (N, C, H, W).  Returns complex64 (N, C, OH, OW)."""
    kh, kw = _pair(kernel_size)
    sh, sw = _pair(stride) if stride is not None else (kh, kw)
    ph, pw = _pair(padding)
    N, C, H, W = x.shape
    run = _build_cavgpool2d(
        int(N), int(C), int(H), int(W), kh, kw, sh, sw, ph, pw,
        bool(ceil_mode), bool(count_include_pad),
        None if divisor_override is None else int(divisor_override))
    return run(x)


# ----------------------------------------------------------------------------
# Pure reference (direct window loops, PyTorch avg_pool2d semantics).
# ----------------------------------------------------------------------------
def ref_cavgpool2d(x, kernel_size, stride=None, padding=0, ceil_mode=False,
                   count_include_pad=True, divisor_override=None):
    kh, kw = _pair(kernel_size)
    sh, sw = _pair(stride) if stride is not None else (kh, kw)
    ph, pw = _pair(padding)
    N, C, H, W = x.shape
    OH = _pool_out_size(H, kh, sh, ph, ceil_mode)
    OW = _pool_out_size(W, kw, sw, pw, ceil_mode)

    xr = np.asarray(jnp.real(x), dtype=np.float64)
    xi = np.asarray(jnp.imag(x), dtype=np.float64)
    xp_r = np.pad(xr, ((0, 0), (0, 0), (ph, ph), (pw, pw)))
    xp_i = np.pad(xi, ((0, 0), (0, 0), (ph, ph), (pw, pw)))

    out = np.zeros((N, C, OH, OW), dtype=np.complex128)
    for oh in range(OH):
        for ow in range(OW):
            hs, ws = oh * sh, ow * sw
            he = min(hs + kh, H + 2 * ph)
            we = min(ws + kw, W + 2 * pw)
            sr = xp_r[:, :, hs:he, ws:we].sum(axis=(2, 3))
            si = xp_i[:, :, hs:he, ws:we].sum(axis=(2, 3))
            if divisor_override is not None:
                div = float(divisor_override)
            elif count_include_pad:
                div = (he - hs) * (we - ws)
            else:
                h0, h1 = max(hs - ph, 0), min(hs - ph + kh, H)
                w0, w1 = max(ws - pw, 0), min(ws - pw + kw, W)
                div = max((h1 - h0) * (w1 - w0), 1)
            out[:, :, oh, ow] = (sr + 1j * si) / div
    return jnp.asarray(out.astype(np.complex64))


if __name__ == "__main__":
    key = jax.random.PRNGKey(0)
    kr, ki = jax.random.split(key)
    N, C, H, W = 2, 4, 16, 16
    x = (jax.random.normal(kr, (N, C, H, W), jnp.float32)
         + 1j * jax.random.normal(ki, (N, C, H, W), jnp.float32)
         ).astype(jnp.complex64)

    # Config 1: common case — kernel_size=2 (stride defaults to kernel_size).
    out = cavg_pool2d(x, kernel_size=2)
    jax.block_until_ready(out)
    ref = ref_cavgpool2d(x, kernel_size=2)
    assert out.shape == (N, C, 8, 8) and out.dtype == jnp.complex64
    assert jnp.allclose(out, ref, rtol=1e-5, atol=1e-5)

    # Config 2: exercise stride / padding / ceil_mode / count_include_pad.
    out2 = cavg_pool2d(x, kernel_size=3, stride=2, padding=1,
                       ceil_mode=True, count_include_pad=False)
    jax.block_until_ready(out2)
    ref2 = ref_cavgpool2d(x, kernel_size=3, stride=2, padding=1,
                          ceil_mode=True, count_include_pad=False)
    assert out2.shape == ref2.shape
    assert jnp.allclose(out2, ref2, rtol=1e-5, atol=1e-5)

    # Config 3: divisor_override path.
    out3 = cavg_pool2d(x, kernel_size=2, divisor_override=3)
    jax.block_until_ready(out3)
    ref3 = ref_cavgpool2d(x, kernel_size=2, divisor_override=3)
    assert jnp.allclose(out3, ref3, rtol=1e-5, atol=1e-5)

    print("KERNEL_OK")
</pallas_src>

<mosaic_0001>
module attributes {stable_mosaic.version = 11 : i64} {
  func.func @_cavgpool2d_kernel(%arg0: memref<16x256xf32, #tpu.memory_space<vmem>>, %arg1: memref<8x16xf32, #tpu.memory_space<vmem>>, %arg2: memref<256x128xf32, #tpu.memory_space<vmem>>, %arg3: memref<8x128xf32, #tpu.memory_space<vmem>>) attributes {dimension_semantics = [], scalar_prefetch = 0 : i64, scratch_operands = 0 : i64, tpu.core_type = #tpu.core_type<tc>} {
    %c0 = arith.constant 0 : index
    %c0_0 = arith.constant 0 : index
    %0 = vector.load %arg1[%c0, %c0_0] : memref<8x16xf32, #tpu.memory_space<vmem>>, vector<8x16xf32>
    %c0_1 = arith.constant 0 : index
    %c0_2 = arith.constant 0 : index
    %1 = vector.load %arg0[%c0_1, %c0_2] : memref<16x256xf32, #tpu.memory_space<vmem>>, vector<16x256xf32>
    %cst = arith.constant dense<0.000000e+00> : vector<8x256xf32>
    %2 = tpu.matmul %0, %1, %cst {dimension_numbers = #tpu.dot_dimension_numbers<[1], [0], [0], [1], [0, 0, 1, 1], [], []>} : vector<8x16xf32>, vector<16x256xf32>, vector<8x256xf32> -> vector<8x256xf32>
    %c0_3 = arith.constant 0 : index
    %c0_4 = arith.constant 0 : index
    %3 = vector.load %arg2[%c0_3, %c0_4] : memref<256x128xf32, #tpu.memory_space<vmem>>, vector<256x128xf32>
    %cst_5 = arith.constant dense<0.000000e+00> : vector<8x128xf32>
    %4 = tpu.matmul %2, %3, %cst_5 {dimension_numbers = #tpu.dot_dimension_numbers<[1], [0], [0], [1], [0, 0, 1, 1], [], []>} : vector<8x256xf32>, vector<256x128xf32>, vector<8x128xf32> -> vector<8x128xf32>
    %c0_6 = arith.constant 0 : index
    %c0_7 = arith.constant 0 : index
    %5 = vector.load %arg3[%c0_6, %c0_7] : memref<8x128xf32, #tpu.memory_space<vmem>>, vector<8x128xf32>
    tpu.vector_store %arg3[%c0_6, %c0_7], %4 {strides = array<i32>} : memref<8x128xf32, #tpu.memory_space<vmem>>, vector<8x128xf32>,
    return
  }
}

</mosaic_0001>

<bundles_post_ra>
// kernel: custom-call.1
= control target key start
LH: loop header
LB: loop body
LE: loop exit
PB: predicated region body
PF: predicated region fallthrough
CT: control target
= control target key end

     0   :  { %s51_s0 = inlined_call_operand.hbm [shape: c64[2,4,16,16], index: 0, kind: input, shape index: {}]   ;;  %s52_s1 = inlined_call_operand.vmem [shape: f32[2,4,16,16], index: 1, kind: output, shape index: {}]  }
   0x1   :  { %s2_s8 = scalar_lea.hbm %s51_s0, 2048 }
   0x2   :  { %3 = vsyncpa [#allocation0], 0  ;;  %s4_s11 = sshll.u32 %s52_s1, 4  ;;  %s5_s11 = int_to_ptr.vmem [resolvable:$true] %s4_s11 }
   0x3   :  { %s20_s12 = scalar_lea.vmem %s5_s11, 2048  ;;  %p25_p1 = scmp.lt.s32.totalorder %s5_s11, %s5_s11 }
   0x4   :  { %p21_p0 = scmp.ne.s32.totalorder %s5_s11, %s20_s12  ;;  %p26_p2 = scmp.lt.s32.totalorder %s20_s12, %s20_s12 }
   0x6   :  { %p27_p3 = por %p26_p2, %p25_p1 }
   0x8   :  { %p28_p4 = pnand %p27_p3, %p21_p0 }
   0xa   :  { %31 = shalt.err (!%p28_p4)  }
   0xb   :  { %7 = dma.hbm_to_vmem [thread:$0]  %s2_s8, 2048, %s5_s11, [#allocation0] }
   0xc   :  { %33 = dma.done.wait [#allocation0], 2048  }
   0xd   :  { %34 = vsyncadd [#allocation0], 4294965248 }
   0xe   :  { %9 = vsyncpa [#allocation0], 1 }

// kernel: custom-call
= control target key start
LH: loop header
LB: loop body
LE: loop exit
PB: predicated region body
PF: predicated region fallthrough
CT: control target
= control target key end

     0   :  { %2 = vsyncpa [#allocation0], 0  ;;  %s47_s0 = inlined_call_operand.hbm [shape: c64[2,4,16,16], index: 0, kind: input, shape index: {}]   ;;  %s48_s1 = inlined_call_operand.vmem [shape: f32[2,4,16,16], index: 1, kind: output, shape index: {}]  }
   0x1   :  { %s3_s8 = sshll.u32 %s48_s1, 4  ;;  %s4_s8 = int_to_ptr.vmem [resolvable:$true] %s3_s8 }
   0x2   :  { %s17_s9 = scalar_lea.vmem %s4_s8, 2048  ;;  %p22_p1 = scmp.lt.s32.totalorder %s4_s8, %s4_s8 }
   0x3   :  { %p18_p0 = scmp.ne.s32.totalorder %s4_s8, %s17_s9  ;;  %p23_p2 = scmp.lt.s32.totalorder %s17_s9, %s17_s9 }
   0x5   :  { %p24_p3 = por %p23_p2, %p22_p1 }
   0x7   :  { %p25_p4 = pnand %p24_p3, %p18_p0 }
   0x9   :  { %28 = shalt.err (!%p25_p4)  }
   0xa   :  { %6 = dma.hbm_to_vmem [thread:$0]  %s47_s0, 2048, %s4_s8, [#allocation0] }
   0xb   :  { %29 = dma.done.wait [#allocation0], 2048  }
   0xc   :  { %30 = vsyncadd [#allocation0], 4294965248 }
   0xd   :  { %8 = vsyncpa [#allocation0], 1 }

// kernel: custom-call.2
= control target key start
LH: loop header
LB: loop body
LE: loop exit
PB: predicated region body
PF: predicated region fallthrough
CT: control target
= control target key end

     0   :  { %s92_s0 = inlined_call_operand.vmem [shape: f32[2,4,8,8], index: 0, kind: input, shape index: {}]   ;;  %s93_s1 = inlined_call_operand.vmem [shape: f32[2,4,8,8], index: 1, kind: input, shape index: {}]   ;;  %s94_s2 = inlined_call_operand.hbm [shape: c64[2,4,8,8], index: 2, kind: output, shape index: {}]  }
   0x1   :  { %s3_s11 = scalar_lea.hbm %s94_s2, 1024 }
   0x2   :  { %4 = vsyncpa [#allocation0], 0  ;;  %s5_s14 = sshll.u32 %s92_s0, 4  ;;  %s6_s14 = int_to_ptr.vmem [resolvable:$true] %s5_s14 }
   0x3   :  { %s18_s15 = scalar_lea.vmem %s6_s14, 1024  ;;  %p23_p1 = scmp.lt.s32.totalorder %s6_s14, %s6_s14 }
   0x4   :  { %p19_p0 = scmp.ne.s32.totalorder %s6_s14, %s18_s15  ;;  %p24_p2 = scmp.lt.s32.totalorder %s18_s15, %s18_s15 }
   0x6   :  { %p25_p3 = por %p24_p2, %p23_p1 }
   0x8   :  { %p26_p4 = pnand %p25_p3, %p19_p0 }
   0xa   :  { %29 = shalt.err (!%p26_p4)  }
   0xb   :  { %8 = dma.vmem_to_hbm [thread:$0]  %s6_s14, 1024, %s94_s2, [#allocation0] }
   0xc   :  { %61 = dma.done.wait [#allocation0], 1024  }
   0xd   :  { %62 = vsyncadd [#allocation0], 4294966272 }
   0xe   :  { %10 = vsyncpa [#allocation0], 1 }
   0xf   :  { %11 = vsyncpa [#allocation1], 0  ;;  %s12_s0 = sshll.u32 %s93_s1, 4  ;;  %s13_s0 = int_to_ptr.vmem [resolvable:$true] %s12_s0 }
  0x10   :  { %s38_s20 = scalar_lea.vmem %s13_s0, 1024  ;;  %p43_p6 = scmp.lt.s32.totalorder %s13_s0, %s13_s0 }
  0x11   :  { %p39_p5 = scmp.ne.s32.totalorder %s13_s0, %s38_s20  ;;  %p44_p7 = scmp.lt.s32.totalorder %s38_s20, %s38_s20 }
  0x13   :  { %p45_p8 = por %p44_p7, %p43_p6 }
  0x15   :  { %p46_p9 = pnand %p45_p8, %p39_p5 }
  0x17   :  { %49 = shalt.err (!%p46_p9)  }
  0x18   :  { %15 = dma.vmem_to_hbm [thread:$0]  %s13_s0, 1024, %s3_s11, [#allocation1] }
  0x19   :  { %63 = dma.done.wait [#allocation1], 1024  }
  0x1a   :  { %64 = vsyncadd [#allocation1], 4294966272 }
  0x1b   :  { %17 = vsyncpa [#allocation1], 1 }

// kernel: run.1
= control target key start
LH: loop header
LB: loop body
LE: loop exit
PB: predicated region body
PF: predicated region fallthrough
CT: control target
= control target key end

     0   :  { %v238_v3 = vmov 0.0   ;;  %vm19_vm0 = vcmask 130048   ;;  %s373_s0 = inlined_call_operand.vmem [shape: f32[16,256], index: 0, kind: input, shape index: {}]   ;;  %s374_s1 = inlined_call_operand.vmem [shape: f32[8,16], index: 1, kind: input, shape index: {}]   ;;  %s375_s2 = inlined_call_operand.vmem [shape: f32[256,128], index: 2, kind: input, shape index: {}]   ;;  %s376_s3 = inlined_call_operand.vmem [shape: f32[8,128], index: 3, kind: output, shape index: {}]  }
   0x1   :  { %v18_v0 = vld [vmem:[%s373_s0 + $0x18] sm:$0xff]  ;;  %v17_v1 = vld [vmem:[%s373_s0 + $0x10] sm:$0xff]  ;;  %v16_v2 = vld [vmem:[%s373_s0 + $0x8] sm:$0xff]  ;;  %87 = vmatprep.mubr.f32.mxu0 %v238_v3 }
   0x2   :  { %51 = vmatprep.subr.mxu0 %v18_v0  ;;  %v15_v4 = vld [vmem:[%s373_s0] sm:$0xff]  ;;  %v125_v6 = vld [vmem:[%s375_s2 + $0xf8] sm:$0xff]  ;;  %v124_v8 = vld [vmem:[%s375_s2 + $0xf0] sm:$0xff] }
   0x3   :  { %v14_v5 = vld [vmem:[%s374_s1] sm:$0xff]  ;;  %52 = vmatpush1.msra.mxu0 %v17_v1  ;;  %202 = vmatprep.subr.mxu1 %v125_v6  ;;  %v109_v7 = vld [vmem:[%s375_s2 + $0x78] sm:$0xff]  ;;  %v108_v9 = vld [vmem:[%s375_s2 + $0x70] sm:$0xff] }
   0x4   :  { %53 = vmatprep.subr.mxu0 %v16_v2  ;;  %203 = vmatpush3.msra.mxu1 %v109_v7  ;;  %v123_v10 = vld [vmem:[%s375_s2 + $0xe8] sm:$0xff]  ;;  %v122_v12 = vld [vmem:[%s375_s2 + $0xe0] sm:$0xff]  ;;  %v121_v14 = vld [vmem:[%s375_s2 + $0xd8] sm:$0xff] }
   0x5   :  { %54 = vmatpush1.msra.mxu0 %v15_v4  ;;  %204 = vmatprep.subr.mxu1 %v124_v8  ;;  %v107_v11 = vld [vmem:[%s375_s2 + $0x68] sm:$0xff]  ;;  %v106_v13 = vld [vmem:[%s375_s2 + $0x60] sm:$0xff]  ;;  %v105_v15 = vld [vmem:[%s375_s2 + $0x58] sm:$0xff] }
   0x6   :  { %201 = vmatmul.mubr.msk.f32.vlgmr.msra.gmra.mxu0 %vm19_vm0, %v14_v5  ;;  %205 = vmatpush3.msra.mxu1 %v108_v9  ;;  %v120_v16 = vld [vmem:[%s375_s2 + $0xd0] sm:$0xff]  ;;  %v119_v18 = vld [vmem:[%s375_s2 + $0xc8] sm:$0xff]  ;;  %v118_v20 = vld [vmem:[%s375_s2 + $0xc0] sm:$0xff] }
   0x7   :  { %206 = vmatprep.subr.mxu1 %v123_v10  ;;  %v104_v17 = vld [vmem:[%s375_s2 + $0x50] sm:$0xff]  ;;  %v103_v19 = vld [vmem:[%s375_s2 + $0x48] sm:$0xff]  ;;  %v102_v21 = vld [vmem:[%s375_s2 + $0x40] sm:$0xff] }
   0x8   :  { %207 = vmatpush3.msra.mxu1 %v107_v11  ;;  %v117_v22 = vld [vmem:[%s375_s2 + $0xb8] sm:$0xff]  ;;  %v116_v24 = vld [vmem:[%s375_s2 + $0xb0] sm:$0xff]  ;;  %v115_v26 = vld [vmem:[%s375_s2 + $0xa8] sm:$0xff] }
   0x9   :  { %208 = vmatprep.subr.mxu1 %v122_v12  ;;  %v101_v23 = vld [vmem:[%s375_s2 + $0x38] sm:$0xff]  ;;  %v100_v25 = vld [vmem:[%s375_s2 + $0x30] sm:$0xff]  ;;  %v99_v27 = vld [vmem:[%s375_s2 + $0x28] sm:$0xff] }
   0xa   :  { %209 = vmatpush3.msra.mxu1 %v106_v13  ;;  %v114_v28 = vld [vmem:[%s375_s2 + $0xa0] sm:$0xff]  ;;  %v113_v30 = vld [vmem:[%s375_s2 + $0x98] sm:$0xff]  ;;  %v112_v32 = vld [vmem:[%s375_s2 + $0x90] sm:$0xff] }
   0xb   :  { %210 = vmatprep.subr.mxu1 %v121_v14  ;;  %v98_v29 = vld [vmem:[%s375_s2 + $0x20] sm:$0xff]  ;;  %v97_v31 = vld [vmem:[%s375_s2 + $0x18] sm:$0xff]  ;;  %v96_v33 = vld [vmem:[%s375_s2 + $0x10] sm:$0xff] }
   0xc   :  { %211 = vmatpush3.msra.mxu1 %v105_v15  ;;  %v111_v34 = vld [vmem:[%s375_s2 + $0x88] sm:$0xff]  ;;  %v110_v36 = vld [vmem:[%s375_s2 + $0x80] sm:$0xff] }
   0xd   :  { %212 = vmatprep.subr.mxu1 %v120_v16  ;;  %v95_v35 = vld [vmem:[%s375_s2 + $0x8] sm:$0xff]  ;;  %v94_v37 = vld [vmem:[%s375_s2] sm:$0xff] }
   0xe   :  { %213 = vmatpush3.msra.mxu1 %v104_v17 }
   0xf   :  { %214 = vmatprep.subr.mxu1 %v119_v18 }
  0x10   :  { %215 = vmatpush3.msra.mxu1 %v103_v19 }
  0x11   :  { %216 = vmatprep.subr.mxu1 %v118_v20 }
  0x12   :  { %217 = vmatpush3.msra.mxu1 %v102_v21 }
  0x13   :  { %218 = vmatprep.subr.mxu1 %v117_v22 }
  0x14   :  { %219 = vmatpush3.msra.mxu1 %v101_v23 }
  0x15   :  { %220 = vmatprep.subr.mxu1 %v116_v24 }
  0x16   :  { %221 = vmatpush3.msra.mxu1 %v100_v25 }
  0x17   :  { %222 = vmatprep.subr.mxu1 %v115_v26 }
  0x18   :  { %223 = vmatpush3.msra.mxu1 %v99_v27 }
  0x19   :  { %224 = vmatprep.subr.mxu1 %v114_v28 }
  0x1a   :  { %225 = vmatpush3.msra.mxu1 %v98_v29 }
  0x1b   :  { %226 = vmatprep.subr.mxu1 %v113_v30 }
  0x1c   :  { %227 = vmatpush3.msra.mxu1 %v97_v31 }
  0x1d   :  { %228 = vmatprep.subr.mxu1 %v112_v32 }
  0x1e   :  { %229 = vmatpush3.msra.mxu1 %v96_v33 }
  0x1f   :  { %230 = vmatprep.subr.mxu1 %v111_v34 }
  0x20   :  { %231 = vmatpush3.msra.mxu1 %v95_v35 }
  0x21   :  { %232 = vmatprep.subr.mxu1 %v110_v36 }
  0x22   :  { %233 = vmatpush3.msra.mxu1 %v94_v37 }
  0xc6   :  { %v89_v38 = vpop.f32.mrf.mxu0 }
  0xc8   :  { %v91_v39 = vpop.f32.mrf.mxu0 }
  0xc9   :  { %190 = vmatprep.mubr.f32.mxu1 %v91_v39 }
  0xca   :  { %191 = vmatmul.mubr.f32.vlgmr.msra.gmra.mxu1 %v89_v38 }
 0x18a   :  { %v234_v40 = vpop.f32.mrf.mxu1 }
 0x18c   :  { %v235_v41 = vpop.f32.mrf.mxu1 }
 0x18d   :  { %v236_v42 = vadd.f32 %v235_v41, %v234_v40 }
 0x18f   :  { %196 = vst [vmem:[%s376_s3] sm:$0xff] %v236_v42 }

</bundles_post_ra>
